<compile_context>
chip_gen: v7x
topology: tpu7x:2x2x1
jax: 0.10.0
libtpu: 0.0.40
codegen_flags: <defaults>
</compile_context>

<pallas_src>
import jax
import jax.numpy as jnp
from jax.experimental import pallas as pl
from jax.experimental.pallas import tpu as pltpu


def net_kernel(x_ref, w1_ref, w2_ref, pack_ref, b3_ref, out_ref):
    x = x_ref[...]                       # (TM, S)
    pack = pack_ref[...]                 # (3, H): rows = b1, b2, w3_row
    b1 = pack[0:1, :]                    # (1, H)
    b2 = pack[1:2, :]                    # (1, H)
    w3 = pack[2:3, :]                    # (1, H)  (row form of out_baseline weight)

    # fc1 + relu (MXU, f32 accumulation)
    h1 = jnp.dot(x, w1_ref[...], preferred_element_type=jnp.float32) + b1
    h1 = jnp.maximum(h1, 0.0)
    # fc2 + relu (MXU, f32 accumulation)
    h2 = jnp.dot(h1, w2_ref[...], preferred_element_type=jnp.float32) + b2
    h2 = jnp.maximum(h2, 0.0)

    # out_baseline: Linear(H -> 1) as VPU multiply + XLU lane-reduce (no N=1 matmul).
    y = jnp.sum(h2 * w3, axis=-1, keepdims=True) + b3_ref[0]    # (TM, 1)

    # Lane-dense, unmasked store: broadcast across the 128-wide output slab;
    # the wrapper slices [:, :1].
    out_ref[...] = jnp.broadcast_to(y, out_ref.shape)


def net_forward(x, packed_params, *, block_m=256):
    """Forward pass of Net: fc1 -> relu -> fc2 -> relu -> out_baseline."""
    w1, w2, pack, b3 = packed_params
    B, S = x.shape
    H = w1.shape[1]

    # Batch tile: multiple of 8 (f32 sublane), capped so VMEM stays small even on v7x (64 MiB).
    tm = min(block_m, max(8, ((B + 7) // 8) * 8))
    b_pad = ((B + tm - 1) // tm) * tm
    if b_pad != B:
        x = jnp.pad(x, ((0, b_pad - B), (0, 0)))
    grid = (b_pad // tm,)

    out_lanes = 128
    flops = 2 * b_pad * (S * H + H * H + H)
    bytes_accessed = 4 * (b_pad * S + S * H + H * H + 3 * H + 1 + b_pad * out_lanes)

    out = pl.pallas_call(
        net_kernel,
        out_shape=jax.ShapeDtypeStruct((b_pad, out_lanes), jnp.float32),
        grid_spec=pltpu.PrefetchScalarGridSpec(
            num_scalar_prefetch=0,
            grid=grid,
            in_specs=[
                pl.BlockSpec((tm, S), lambda i: (i, 0)),   # x: tiled over batch
                pl.BlockSpec((S, H), lambda i: (0, 0)),    # w1: resident
                pl.BlockSpec((H, H), lambda i: (0, 0)),    # w2: resident
                pl.BlockSpec((3, H), lambda i: (0, 0)),    # packed [b1; b2; w3_row]: resident
                pl.BlockSpec(memory_space=pltpu.MemorySpace.SMEM),  # b3 scalar (no VMEM tile)
            ],
            out_specs=pl.BlockSpec((tm, out_lanes), lambda i: (i, 0)),
        ),
        compiler_params=pltpu.CompilerParams(
            dimension_semantics=("parallel",),  # v7x: split batch tiles across both TCs
        ),
        cost_estimate=pl.CostEstimate(
            flops=flops, transcendentals=0, bytes_accessed=bytes_accessed
        ),
    )(x, w1, w2, pack, b3)

    return out[:B, :1]


def init_params(key, n_states, n_hidden):
    """Deterministic init mimicking nn.Linear's uniform(-1/sqrt(fan_in), 1/sqrt(fan_in)).

    Returns (packed_params_for_kernel, raw_params_for_reference).
    """
    ks = jax.random.split(key, 6)

    def linear(kw, kb, fan_in, fan_out):
        bound = 1.0 / jnp.sqrt(float(fan_in))
        w = jax.random.uniform(kw, (fan_in, fan_out), jnp.float32, -bound, bound)  # [in, out]
        b = jax.random.uniform(kb, (1, fan_out), jnp.float32, -bound, bound)
        return w, b

    w1, b1 = linear(ks[0], ks[1], n_states, n_hidden)   # (S,H), (1,H)
    w2, b2 = linear(ks[2], ks[3], n_hidden, n_hidden)   # (H,H), (1,H)
    w3, b3 = linear(ks[4], ks[5], n_hidden, 1)          # (H,1), (1,1)

    w3_row = w3.T                                        # (1,H) row form for mul+reduce
    pack = jnp.concatenate([b1, b2, w3_row], axis=0)     # (3,H) single VMEM input
    b3_smem = b3.reshape((1,)).astype(jnp.float32)       # scalar via SMEM

    packed = (w1, w2, pack, b3_smem)
    raw = (w1, b1, w2, b2, w3, b3)
    return packed, raw


if __name__ == "__main__":
    # TODO(synk): num_flat_features is a Python-side helper unused by forward(); omitted.
    key = jax.random.PRNGKey(0)
    k_in, k_par = jax.random.split(key)

    batch = 8
    n_states = 16
    n_hidden = 32

    x = jax.random.normal(k_in, (batch, n_states), dtype=jnp.float32)
    packed, raw = init_params(k_par, n_states, n_hidden)

    out = net_forward(x, packed)
    out = jax.block_until_ready(out)

    # reference check in plain JAX
    w1, b1, w2, b2, w3, b3 = raw
    h1 = jnp.maximum(x @ w1 + b1, 0.0)
    h2 = jnp.maximum(h1 @ w2 + b2, 0.0)
    ref = h2 @ w3 + b3
    assert out.shape == (batch, 1)
    assert jnp.allclose(out, ref, atol=1e-5, rtol=1e-5)

    print("KERNEL_OK")
</pallas_src>

<mosaic_0001>
module attributes {stable_mosaic.version = 11 : i64} {
  func.func @net_kernel(%arg0: i32, %arg1: memref<8x16xf32, #tpu.memory_space<vmem>>, %arg2: memref<16x32xf32, #tpu.memory_space<vmem>>, %arg3: memref<32x32xf32, #tpu.memory_space<vmem>>, %arg4: memref<3x32xf32, #tpu.memory_space<vmem>>, %arg5: memref<1xf32, #tpu.memory_space<smem>>, %arg6: memref<8x128xf32, #tpu.memory_space<vmem>>) attributes {dimension_semantics = [#tpu.dimension_semantics<parallel>], iteration_bounds = array<i64: 1>, scalar_prefetch = 0 : i64, scratch_operands = 0 : i64, tpu.core_type = #tpu.core_type<tc>, window_params = [{transform_indices = @transform_0, window_bounds = array<i64: 8, 16>}, {pipeline_mode = #tpu.pipeline_mode<synchronous>, transform_indices = @transform_1, window_bounds = array<i64: 16, 32>}, {pipeline_mode = #tpu.pipeline_mode<synchronous>, transform_indices = @transform_2, window_bounds = array<i64: 32, 32>}, {pipeline_mode = #tpu.pipeline_mode<synchronous>, transform_indices = @transform_3, window_bounds = array<i64: 3, 32>}, {transform_indices = @transform_4, window_bounds = array<i64: 1>}, {transform_indices = @transform_5, window_bounds = array<i64: 8, 128>}]} {
    %c0 = arith.constant 0 : index
    %c0_0 = arith.constant 0 : index
    %0 = vector.load %arg1[%c0, %c0_0] : memref<8x16xf32, #tpu.memory_space<vmem>>, vector<8x16xf32>
    %c0_1 = arith.constant 0 : index
    %c0_2 = arith.constant 0 : index
    %1 = vector.load %arg4[%c0_1, %c0_2] : memref<3x32xf32, #tpu.memory_space<vmem>>, vector<3x32xf32>
    %2 = vector.extract_strided_slice %1 {offsets = [0, 0], sizes = [1, 32], strides = [1, 1]} : vector<3x32xf32> to vector<1x32xf32>
    %3 = vector.extract_strided_slice %1 {offsets = [1, 0], sizes = [1, 32], strides = [1, 1]} : vector<3x32xf32> to vector<1x32xf32>
    %4 = vector.extract_strided_slice %1 {offsets = [2, 0], sizes = [1, 32], strides = [1, 1]} : vector<3x32xf32> to vector<1x32xf32>
    %c0_3 = arith.constant 0 : index
    %c0_4 = arith.constant 0 : index
    %5 = vector.load %arg2[%c0_3, %c0_4] : memref<16x32xf32, #tpu.memory_space<vmem>>, vector<16x32xf32>
    %cst = arith.constant dense<0.000000e+00> : vector<8x32xf32>
    %6 = tpu.matmul %0, %5, %cst {dimension_numbers = #tpu.dot_dimension_numbers<[1], [0], [0], [1], [0, 0, 1, 1], [], []>} : vector<8x16xf32>, vector<16x32xf32>, vector<8x32xf32> -> vector<8x32xf32>
    %7 = vector.broadcast %2 : vector<1x32xf32> to vector<8x32xf32>
    %8 = arith.addf %6, %7 : vector<8x32xf32>
    %cst_5 = arith.constant 0.000000e+00 : f32
    %9 = vector.broadcast %cst_5 : f32 to vector<8x32xf32>
    %10 = arith.maximumf %8, %9 : vector<8x32xf32>
    %c0_6 = arith.constant 0 : index
    %c0_7 = arith.constant 0 : index
    %11 = vector.load %arg3[%c0_6, %c0_7] : memref<32x32xf32, #tpu.memory_space<vmem>>, vector<32x32xf32>
    %cst_8 = arith.constant dense<0.000000e+00> : vector<8x32xf32>
    %12 = tpu.matmul %10, %11, %cst_8 {dimension_numbers = #tpu.dot_dimension_numbers<[1], [0], [0], [1], [0, 0, 1, 1], [], []>} : vector<8x32xf32>, vector<32x32xf32>, vector<8x32xf32> -> vector<8x32xf32>
    %13 = vector.broadcast %3 : vector<1x32xf32> to vector<8x32xf32>
    %14 = arith.addf %12, %13 : vector<8x32xf32>
    %cst_9 = arith.constant 0.000000e+00 : f32
    %15 = vector.broadcast %cst_9 : f32 to vector<8x32xf32>
    %16 = arith.maximumf %14, %15 : vector<8x32xf32>
    %17 = vector.broadcast %4 : vector<1x32xf32> to vector<8x32xf32>
    %18 = arith.mulf %16, %17 : vector<8x32xf32>
    %cst_10 = arith.constant dense<0.000000e+00> : vector<8xf32>
    %19 = vector.multi_reduction <add>, %18, %cst_10 [1] : vector<8x32xf32> to vector<8xf32>
    %20 = vector.shape_cast %19 : vector<8xf32> to vector<8x1xf32>
    %c0_11 = arith.constant 0 : index
    %21 = memref.load %arg5[%c0_11] : memref<1xf32, #tpu.memory_space<smem>>
    %22 = vector.broadcast %21 : f32 to vector<8x1xf32>
    %23 = arith.addf %20, %22 : vector<8x1xf32>
    %24 = vector.shape_cast %23 : vector<8x1xf32> to vector<8x1xf32>
    %25 = vector.broadcast %24 : vector<8x1xf32> to vector<8x128xf32>
    %c0_12 = arith.constant 0 : index
    %c0_13 = arith.constant 0 : index
    %26 = vector.load %arg6[%c0_12, %c0_13] : memref<8x128xf32, #tpu.memory_space<vmem>>, vector<8x128xf32>
    tpu.vector_store %arg6[%c0_12, %c0_13], %25 {strides = array<i32>} : memref<8x128xf32, #tpu.memory_space<vmem>>, vector<8x128xf32>,
    return
  }
  func.func @transform_0(%arg0: i32) -> (i32, i32) {
    %c0_i32 = arith.constant 0 : i32
    %c0_i32_0 = arith.constant 0 : i32
    return %arg0, %c0_i32 : i32, i32
  }
  func.func @transform_1(%arg0: i32) -> (i32, i32) {
    %c0_i32 = arith.constant 0 : i32
    %c0_i32_0 = arith.constant 0 : i32
    %c0_i32_1 = arith.constant 0 : i32
    return %c0_i32, %c0_i32_0 : i32, i32
  }
  func.func @transform_2(%arg0: i32) -> (i32, i32) {
    %c0_i32 = arith.constant 0 : i32
    %c0_i32_0 = arith.constant 0 : i32
    %c0_i32_1 = arith.constant 0 : i32
    return %c0_i32, %c0_i32_0 : i32, i32
  }
  func.func @transform_3(%arg0: i32) -> (i32, i32) {
    %c0_i32 = arith.constant 0 : i32
    %c0_i32_0 = arith.constant 0 : i32
    %c0_i32_1 = arith.constant 0 : i32
    return %c0_i32, %c0_i32_0 : i32, i32
  }
  func.func @transform_4(%arg0: i32) -> i32 {
    %c0_i32 = arith.constant 0 : i32
    %c0_i32_0 = arith.constant 0 : i32
    return %c0_i32 : i32
  }
  func.func @transform_5(%arg0: i32) -> (i32, i32) {
    %c0_i32 = arith.constant 0 : i32
    %c0_i32_0 = arith.constant 0 : i32
    return %arg0, %c0_i32 : i32, i32
  }
}

</mosaic_0001>

<bundles_post_ra>
// kernel: tpu_custom_call.1
= control target key start
LH: loop header
LB: loop body
LE: loop exit
PB: predicated region body
PF: predicated region fallthrough
CT: control target
= control target key end

     0   :  { %11 = vsyncpa [#allocation4], 0  ;;  %s494_s0 = inlined_call_operand.hbm [shape: f32[8,16], index: 0, kind: input, shape index: {}]   ;;  %s495_s1 = inlined_call_operand.hbm [shape: f32[16,32], index: 1, kind: input, shape index: {}]   ;;  %s496_s2 = inlined_call_operand.hbm [shape: f32[32,32], index: 2, kind: input, shape index: {}]   ;;  %s497_s3 = inlined_call_operand.vmem [shape: f32[3,32], index: 3, kind: input, shape index: {}]   ;;  %s498_s4 = inlined_call_operand.<no memory space> [shape: f32[1], index: 4, kind: input, shape index: {}]   ;;  %s499_s5 = inlined_call_operand.hbm [shape: f32[8,128], index: 5, kind: output, shape index: {}]  }
   0x1   :  { %12 = vsyncpa [#allocation7], 0 }
   0x2   :  { %13 = vsyncpa [#allocation5], 0  ;;  %s395_s18 = smov [#allocation6]   ;;  %s301_s22 = scalar_lea.hbm %s495_s1, 256 }
   0x3   :  { %s29_s19 = sshll.u32 %s395_s18, 4  ;;  %p302_p0 = scmp.ne.s32.totalorder %s495_s1, %s301_s22  ;;  %s30_s19 = int_to_ptr.vmem [resolvable:$true] %s29_s19 }
   0x4   :  { %p305_p1 = scmp.lt.u32.totalorder %s301_s22, %s495_s1 }
   0x6   :  { %p307_p2 = pnand %p305_p1, %p302_p0 }
   0x8   :  { %310 = shalt.err (!%p307_p2)
}
   0x9   :  { %s311_s27 = scalar_lea.vmem %s30_s19, 256  ;;  %p316_p4 = scmp.lt.s32.totalorder %s30_s19, %s30_s19 }
   0xa   :  { %p312_p3 = scmp.ne.s32.totalorder %s30_s19, %s311_s27  ;;  %p317_p5 = scmp.lt.s32.totalorder %s311_s27, %s311_s27 }
   0xc   :  { %p318_p6 = por %p317_p5, %p316_p4 }
   0xe   :  { %p319_p7 = pnand %p318_p6, %p312_p3 }
  0x10   :  { %322 = shalt.err (!%p319_p7)
}
  0x11   :  { %s396_s28 = smov 128   ;;  %s397_s29 = smov 8  }
  0x12   :  { %35 = dma.hbm_to_vmem [thread:$0]  %s495_s1, 256, %s30_s19, [#allocation7], %s396_s28, %s396_s28, %s397_s29  }
  0x13   :  { %s398_s7 = smov [#allocation3]   ;;  %s399_s9 = smov [#allocation8]  }
  0x14   :  { %s20_s8 = sshll.u32 %s398_s7, 4  ;;  %s41_s10 = sshll.u32 %s399_s9, 4  ;;  %s21_s8 = int_to_ptr.vmem [resolvable:$true] %s20_s8  ;;  %s42_s10 = int_to_ptr.vmem [resolvable:$true] %s41_s10 }
  0x15   :  { %s323_s13 = scalar_lea.hbm %s494_s0, 128 }
  0x16   :  { %p324_p8 = scmp.ne.s32.totalorder %s494_s0, %s323_s13  ;;  %p327_p9 = scmp.lt.u32.totalorder %s323_s13, %s494_s0 }
  0x18   :  { %p329_p10 = pnand %p327_p9, %p324_p8 }
  0x1a   :  { %332 = shalt.err (!%p329_p10)
}
  0x1b   :  { %s333_s1 = scalar_lea.vmem %s21_s8, 128  ;;  %p338_p12 = scmp.lt.s32.totalorder %s21_s8, %s21_s8 }
  0x1c   :  { %p334_p11 = scmp.ne.s32.totalorder %s21_s8, %s333_s1  ;;  %p339_p13 = scmp.lt.s32.totalorder %s333_s1, %s333_s1 }
  0x1e   :  { %p340_p0 = por %p339_p13, %p338_p12 }
  0x20   :  { %p341_p1 = pnand %p340_p0, %p334_p11 }
  0x22   :  { %344 = shalt.err (!%p341_p1)
}
  0x23   :  { %23 = dma.hbm_to_vmem [thread:$0]  %s494_s0, 128, %s21_s8, [#allocation4]  }
  0x24   :  { %s345_s22 = scalar_lea.hbm %s496_s2, 512 }
  0x25   :  { %p346_p2 = scmp.ne.s32.totalorder %s496_s2, %s345_s22  ;;  %p349_p3 = scmp.lt.u32.totalorder %s345_s22, %s496_s2 }
  0x27   :  { %p351_p4 = pnand %p349_p3, %p346_p2 }
  0x29   :  { %354 = shalt.err (!%p351_p4)
}
  0x2a   :  { %s355_s27 = scalar_lea.vmem %s42_s10, 512  ;;  %p360_p6 = scmp.lt.s32.totalorder %s42_s10, %s42_s10 }
  0x2b   :  { %p356_p5 = scmp.ne.s32.totalorder %s42_s10, %s355_s27  ;;  %p361_p7 = scmp.lt.s32.totalorder %s355_s27, %s355_s27 }
  0x2d   :  { %p362_p8 = por %p361_p7, %p360_p6 }
  0x2f   :  { %p363_p9 = pnand %p362_p8, %p356_p5 }
  0x31   :  { %366 = shalt.err (!%p363_p9)
}
  0x32   :  { %47 = dma.hbm_to_vmem [thread:$0]  %s496_s2, 512, %s42_s10, [#allocation7], %s396_s28, %s396_s28, %s397_s29  }
  0x33   :  { %389 = dma.done.wait [#allocation4], 128  }
  0x34   :  { %390 = vsyncadd [#allocation4], 4294967168 }
  0x35   :  { %391 = dma.done.wait [#allocation7], 768  }
  0x36   :  { %392 = vsyncadd [#allocation7], 4294966528  ;;  %v400_v0 = vmov 0.0|0.0   ;;  %vm401_vm0 = vmmov 0   ;;  %v402_v1 = vmov 0.0   ;;  %v63_v2 = vld [vmem:[#allocation6] sm:$0xff]  ;;  %v65_v12 = vlaneseq }
  0x37   :  { %283 = vmatprep.subr.bf16.mxu0 %v400_v0  ;;  %269 = vmatprep.mubr.msk.f32.mxu0 %vm401_vm0, %v402_v1  ;;  %v64_v3 = vld [vmem:[#allocation6 + $0x8] sm:$0xff]  ;;  %v144_v5 = vld [vmem:[#allocation8] sm:$0xff]  ;;  %v145_v6 = vld [vmem:[#allocation8 + $0x8] sm:$0xff]  ;;  %vm69_vm1 = vcmask 130048   ;;  %vm152_vm2 = vcmask 261120   ;;  %v236_v31 = vstv %s498_s4  ;;  %s403_s6 = smov [#allocation9]  }
  0x38   :  { %286 = vmatprep.subr.bf16.mxu1 %v400_v0  ;;  %280 = vmatprep.mubr.msk.f32.mxu1 %vm401_vm0, %v402_v1  ;;  %v284_v4 = vpack.c.bf16 %v64_v3, %v63_v2  ;;  %v287_v7 = vpack.c.bf16 %v145_v6, %v144_v5  ;;  %v61_v8 = vld [vmem:[#allocation3] sm:$0xff]  ;;  %v146_v9 = vld [vmem:[#allocation8 + $0x10] sm:$0xff]  ;;  %v147_v10 = vld [vmem:[#allocation8 + $0x18] sm:$0xff]  ;;  %v66_v13 = vshrl.u32 %v65_v12, 7  ;;  %s245_s7 = sshll.u32 %s403_s6, 4  ;;  %s246_s7 = int_to_ptr.vmem [resolvable:$true] %s245_s7 }
  0x39   :  { %v290_v11 = vpack.c.bf16 %v147_v10, %v146_v9  ;;  %v62_v15 = vld [vmem:[%s497_s3] sm:$0x7]  ;;  %s367_s8 = scalar_lea.vmem %s246_s7, 128  ;;  %p372_p11 = scmp.lt.s32.totalorder %s246_s7, %s246_s7 }
  0x3a   :  { %285 = vmatpush3.bf16.msra.mxu0 %v284_v4  ;;  %288 = vmatpush3.bf16.msra.mxu1 %v287_v7  ;;  %v67_v14 = vsub.s32 0, %v66_v13  ;;  %v150_v21 = vsub.s32 1, %v66_v13  ;;  %v229_v23 = vsub.s32 2, %v66_v13  ;;  %p368_p10 = scmp.ne.s32.totalorder %s246_s7, %s367_s8  ;;  %p373_p12 = scmp.lt.s32.totalorder %s367_s8, %s367_s8 }
  0x3b   :  { %289 = vmatprep.subr.bf16.mxu1 %v400_v0 }
  0x3c   :  { %v68_v16 = vrot.slane %v62_v15, %v67_v14  ;;  %v151_v22 = vrot.slane %v62_v15, %v150_v21  ;;  %v230_v27 = vrot.slane %v62_v15, %v229_v23  ;;  %p374_p13 = por %p373_p12, %p372_p11 }
  0x3d   :  { %270 = vmatmul.mubr.msk.f32.vlgmr.msra.gmra.mrb[0].mxu0 %vm69_vm1, %v61_v8 }
  0x3e   :  { %291 = vmatpush3.bf16.msra.mxu1 %v290_v11  ;;  %p375_p0 = pnand %p374_p13, %p368_p10 }
 0x110   :  { %v139_v17 = vpop.f32.mrb[0].mxu0 }
 0x111   :  { %v140_v18 = vadd.f32 %v139_v17, %v68_v16  ;;  %v271_v19 = vpop.f32.mrb[1].mxu0 }
 0x113   :  { %v143_v20 = vmax.f32 %v140_v18, 0.0 }
 0x115   :  { %281 = vmatmul.mubr.msk.f32.vlgmr.msra.gmra.mrb[0].mxu1 %vm152_vm2, %v143_v20 }
 0x1e8   :  { %v222_v24 = vpop.f32.mrb[0].mxu1 }
 0x1e9   :  { %v223_v25 = vadd.f32 %v222_v24, %v151_v22  ;;  %v282_v26 = vpop.f32.mrb[1].mxu1 }
 0x1eb   :  { %v226_v28 = vmax.f32 %v223_v25, 0.0 }
 0x1ed   :  { %v231_v29 = vmul.f32 %v230_v27, %v226_v28 }
 0x1ef   :  { %v232_v30 = vsel %vm152_vm2, %v231_v29, 0.0 }
 0x1f0   :  { %233 = vadd.xlane.f32.xlu0 %v232_v30 }
 0x27d   :  { %v234_v32 = vpop.xlane.xlu0 %233 }
 0x27e   :  { %v237_v33 = vadd.f32 %v236_v31, %v234_v32 }
 0x280   :  { %238 = vst [vmem:[#allocation9] sm:$0xff] %v237_v33 }
 0x281   :  { %378 = shalt.err (!%p375_p0)
}
 0x282   :  { %s379_s11 = scalar_lea.hbm %s499_s5, 128 }
 0x283   :  { %p380_p1 = scmp.ne.s32.totalorder %s499_s5, %s379_s11  ;;  %p383_p2 = scmp.lt.u32.totalorder %s379_s11, %s499_s5 }
 0x285   :  { %p385_p3 = pnand %p383_p2, %p380_p1 }
 0x287   :  { %388 = shalt.err (!%p385_p3)
}
 0x288   :  { %248 = dma.vmem_to_hbm [thread:$0]  %s246_s7, 128, %s499_s5, [#allocation5]  }
 0x289   :  { %393 = dma.done.wait [#allocation5], 128  }
 0x28a   :  { %394 = vsyncadd [#allocation5], 4294967168 }
 0x28b   :  { %252 = vsyncpa [#allocation4], 1 }
 0x28c   :  { %253 = vsyncpa [#allocation7], 1 }
 0x28d   :  { %254 = vsyncpa [#allocation5], 1 }

</bundles_post_ra>
